<compile_context>
chip_gen: v6e
topology: v6e:2x2x1
jax: 0.10.0
libtpu: 0.0.40
codegen_flags: <defaults>
</compile_context>

<pallas_src>
import functools
import math

import jax
import jax.numpy as jnp
from jax import lax
from jax.experimental import pallas as pl
from jax.experimental.pallas import tpu as pltpu


_VMEM = pl.BlockSpec(memory_space=pltpu.MemorySpace.VMEM)


# ----------------------------- in-kernel helpers ----------------------------

def _sym_norm(A):
    """Symmetric GCN normalization D^{-1/2} (A + I) D^{-1/2}, fully in-kernel.

    Row/column degree reductions run on the XLU, rsqrt on the EUP (free slots).
    For symmetric A row sums == column sums, matching the reference norm.
    """
    n = A.shape[0]
    rows = lax.broadcasted_iota(jnp.int32, (n, n), 0)
    cols = lax.broadcasted_iota(jnp.int32, (n, n), 1)
    a_hat = A + (rows == cols).astype(A.dtype)
    deg_r = jnp.sum(a_hat, axis=1, keepdims=True)     # [n, 1]
    deg_c = jnp.sum(a_hat, axis=0, keepdims=True)     # [1, n]
    dinv_r = jnp.where(deg_r > 0, lax.rsqrt(deg_r), 0.0)
    dinv_c = jnp.where(deg_c > 0, lax.rsqrt(deg_c), 0.0)
    return dinv_r * a_hat * dinv_c


# --------------------------------- kernels ----------------------------------

def _gcn_pool_score_kernel(a_ref, x_ref, w_ref, b_ref, p_ref,
                           out_ref, act_ref, score_ref, *, k_hops):
    """Fused graph-1 branch: gcn_norm + k-hop propagation + linear + ReLU +
    pooling score.  Everything stays in VMEM/vregs; one HBM round trip."""
    # TODO(synk): exact GCN-with-k semantics unknown; SGC-style k-hop
    # propagation followed by a single linear layer is used.
    a_n = _sym_norm(a_ref[...])
    h = x_ref[...]
    for _ in range(k_hops):                        # unrolled at trace time
        h = jnp.dot(a_n, h, preferred_element_type=jnp.float32)
    out = jnp.dot(h, w_ref[...], preferred_element_type=jnp.float32) + b_ref[...]
    out_ref[...] = out
    act = jnp.maximum(out, 0.0)
    act_ref[...] = act
    # pooling score = <x1, p> as a VPU reduction (no lane-width-1 matmul)
    score_ref[...] = jnp.sum(act * p_ref[...], axis=1, keepdims=True)


def _pool_block_kernel(xsup_ref, x1_ref, a1_ref, lt_ref,
                       w_gcn_ref, b_gcn_ref, w_mlp_ref, b_mlp_ref,
                       s_ref, sup1_ref, sup2_ref, qt_ref, *, inv_temp):
    """Fused TransPool block + GCNConv(nhid,nhid) + MLP1 + Q^T = L^T S^T."""
    # TODO(synk): TransPool source unavailable; top-k super nodes (selected
    # outside) + temperature softmax soft assignment over super nodes.
    xsup = xsup_ref[...]
    x1 = x1_ref[...]
    # logits[s, i] = <x_sup[s], x1[i]> / T   (rhs-transposed contraction)
    logits = lax.dot_general(xsup, x1, (((1,), (1,)), ((), ())),
                             preferred_element_type=jnp.float32) * inv_temp
    m = jnp.max(logits, axis=0, keepdims=True)
    e = jnp.exp(logits - m)
    denom = jnp.sum(e, axis=0, keepdims=True)
    S = e * pl.reciprocal(denom, approx=True)      # EUP reciprocal
    s_ref[...] = S

    x_pool = jnp.dot(S, x1, preferred_element_type=jnp.float32)
    sa = jnp.dot(S, a1_ref[...], preferred_element_type=jnp.float32)
    a_pool = lax.dot_general(sa, S, (((1,), (1,)), ((), ())),      # S A1 S^T
                             preferred_element_type=jnp.float32)
    h2 = jnp.dot(_sym_norm(a_pool), x_pool, preferred_element_type=jnp.float32)
    sup1 = jnp.maximum(
        jnp.dot(h2, w_gcn_ref[...], preferred_element_type=jnp.float32)
        + b_gcn_ref[...], 0.0)
    sup1_ref[...] = sup1
    sup2 = jnp.maximum(
        jnp.dot(sup1, w_mlp_ref[...], preferred_element_type=jnp.float32)
        + b_mlp_ref[...], 0.0)
    sup2_ref[...] = sup2
    # Q^T = L^T S^T  (rhs-transposed contraction; no transposes materialized)
    qt_ref[...] = lax.dot_general(lt_ref[...], S, (((1,), (1,)), ((), ())),
                                  preferred_element_type=jnp.float32)


def _graph2_out_kernel(a2_ref, y_ref, w0_ref, b0_ref,
                       qt_ref, sup2_ref, lt_ref, outx_ref,
                       w1_ref, bl_ref, w2_ref, wm_ref, bm_ref,
                       outy_ref, recon_ref, *, k_hops):
    """Fused graph-2 GCN branch + LastLayer + MLP2."""
    a_n = _sym_norm(a2_ref[...])
    h = y_ref[...]
    for _ in range(k_hops):
        h = jnp.dot(a_n, h, preferred_element_type=jnp.float32)
    out_y = jnp.dot(h, w0_ref[...], preferred_element_type=jnp.float32) + b0_ref[...]

    # TODO(synk): LastLayer source unavailable; using
    #   last = (Q^T sup2) W1 + b  +  (L^T out_x) W2
    last = jnp.dot(
        jnp.dot(qt_ref[...], sup2_ref[...], preferred_element_type=jnp.float32),
        w1_ref[...], preferred_element_type=jnp.float32) + bl_ref[...]
    last = last + jnp.dot(
        jnp.dot(lt_ref[...], outx_ref[...], preferred_element_type=jnp.float32),
        w2_ref[...], preferred_element_type=jnp.float32)
    out_y = out_y + last
    outy_ref[...] = out_y
    recon_ref[...] = (jnp.dot(out_y, wm_ref[...],
                              preferred_element_type=jnp.float32) + bm_ref[...])


# ------------------------------ pallas wrappers ------------------------------

def gcn_pool_score(A, x, W, b, p, k_hops):
    n = x.shape[0]
    nhid = W.shape[1]
    return pl.pallas_call(
        functools.partial(_gcn_pool_score_kernel, k_hops=k_hops),
        out_shape=(jax.ShapeDtypeStruct((n, nhid), jnp.float32),
                   jax.ShapeDtypeStruct((n, nhid), jnp.float32),
                   jax.ShapeDtypeStruct((n, 1), jnp.float32)),
        in_specs=[_VMEM] * 5,
        out_specs=(_VMEM, _VMEM, _VMEM),
    )(A.astype(jnp.float32), x.astype(jnp.float32),
      W.astype(jnp.float32), b.reshape(1, -1).astype(jnp.float32),
      p.reshape(1, -1).astype(jnp.float32))


def pool_block(x_sup, x1, A1, LT, w_gcn, b_gcn, w_mlp, b_mlp, temperature):
    k = x_sup.shape[0]
    n1, nhid = x1.shape
    n2 = LT.shape[0]
    return pl.pallas_call(
        functools.partial(_pool_block_kernel, inv_temp=float(1.0 / temperature)),
        out_shape=(jax.ShapeDtypeStruct((k, n1), jnp.float32),
                   jax.ShapeDtypeStruct((k, nhid), jnp.float32),
                   jax.ShapeDtypeStruct((k, nhid), jnp.float32),
                   jax.ShapeDtypeStruct((n2, k), jnp.float32)),
        in_specs=[_VMEM] * 8,
        out_specs=(_VMEM,) * 4,
    )(x_sup.astype(jnp.float32), x1.astype(jnp.float32),
      A1.astype(jnp.float32), LT.astype(jnp.float32),
      w_gcn.astype(jnp.float32), b_gcn.reshape(1, -1).astype(jnp.float32),
      w_mlp.astype(jnp.float32), b_mlp.reshape(1, -1).astype(jnp.float32))


def graph2_and_output(A2, y, W0, b0, QT, sup2, LT, out_x,
                      W1, b_last, W2, Wm, bm, k_hops):
    n2 = y.shape[0]
    nhid = W0.shape[1]
    out_ch = Wm.shape[1]
    return pl.pallas_call(
        functools.partial(_graph2_out_kernel, k_hops=k_hops),
        out_shape=(jax.ShapeDtypeStruct((n2, nhid), jnp.float32),
                   jax.ShapeDtypeStruct((n2, out_ch), jnp.float32)),
        in_specs=[_VMEM] * 13,
        out_specs=(_VMEM, _VMEM),
    )(A2.astype(jnp.float32), y.astype(jnp.float32),
      W0.astype(jnp.float32), b0.reshape(1, -1).astype(jnp.float32),
      QT.astype(jnp.float32), sup2.astype(jnp.float32),
      LT.astype(jnp.float32), out_x.astype(jnp.float32),
      W1.astype(jnp.float32), b_last.reshape(1, -1).astype(jnp.float32),
      W2.astype(jnp.float32),
      Wm.astype(jnp.float32), bm.reshape(1, -1).astype(jnp.float32))


# --------------------------------- params -----------------------------------

def glorot(key, shape):
    limit = math.sqrt(6.0 / (shape[0] + shape[1]))
    return jax.random.uniform(key, shape, jnp.float32, -limit, limit)


def init_params(key, in_channels, nhid, out_channels):
    ks = jax.random.split(key, 10)
    return {
        # GCN(in_channels, nhid, k=10)  (shared between x-graph and y-graph)
        "gcn0_W": glorot(ks[0], (in_channels, nhid)),
        "gcn0_b": jnp.zeros((nhid,), jnp.float32),
        # GCNConv(nhid, nhid) on the pooled graph
        "gcn1_W": glorot(ks[1], (nhid, nhid)),
        "gcn1_b": jnp.zeros((nhid,), jnp.float32),
        # TransPool scoring vector
        "pool_p": glorot(ks[2], (nhid, 1)),
        # MLP1
        "mlp1_W": glorot(ks[3], (nhid, nhid)),
        "mlp1_b": jnp.zeros((nhid,), jnp.float32),
        # LastLayer(nhid, nhid)
        "last_W1": glorot(ks[4], (nhid, nhid)),
        "last_W2": glorot(ks[5], (nhid, nhid)),
        "last_b": jnp.zeros((nhid,), jnp.float32),
        # MLP2
        "mlp2_W": glorot(ks[6], (nhid, out_channels)),
        "mlp2_b": jnp.zeros((out_channels,), jnp.float32),
    }


# --------------------------------- forward ----------------------------------

def nettrans_forward(params, x, A1, y, A2, L, temperature,
                     pool_ratio=0.5, k_hops=10):
    """depth = 1 configuration of NetTrans.forward (3 fused pallas_calls)."""
    n1 = x.shape[0]
    LT = L.T  # single input-side transpose at trace time (not an intermediate)

    # --- down_convs[0] on graph 1 + act + pooling score (1 fused kernel) ----
    out_x, x1, score = gcn_pool_score(A1, x, params["gcn0_W"],
                                      params["gcn0_b"], params["pool_p"],
                                      k_hops)

    # --- TransPool super-node selection (tiny data-dependent step in JAX) ---
    k_sup = int(math.ceil(pool_ratio * n1))
    _, sup_idx = lax.top_k(score[:, 0], k_sup)
    x_sup = x1[sup_idx]                                        # [k_sup, nhid]

    # --- TransPool assignment + GCNConv + MLP1 + Q^T (1 fused kernel) -------
    S, sup1, sup2, QT = pool_block(x_sup, x1, A1, LT,
                                   params["gcn1_W"], params["gcn1_b"],
                                   params["mlp1_W"], params["mlp1_b"],
                                   temperature)

    # --- depth-1 == 0: TransUnPool loop not exercised -----------------------
    # TODO(synk): TransUnPool not implemented (never runs with depth=1).

    # --- down_convs[0] on graph 2 + LastLayer + MLP2 (1 fused kernel) -------
    out_y, recon_y = graph2_and_output(A2, y, params["gcn0_W"],
                                       params["gcn0_b"], QT, sup2, LT, out_x,
                                       params["last_W1"], params["last_b"],
                                       params["last_W2"],
                                       params["mlp2_W"], params["mlp2_b"],
                                       k_hops)

    # assign_mats as COO (indices, values) of the dense assignment matrix S
    rows = lax.broadcasted_iota(jnp.int32, (k_sup, n1), 0).reshape(-1)
    cols = lax.broadcasted_iota(jnp.int32, (k_sup, n1), 1).reshape(-1)
    assign_index = jnp.stack([rows, cols], axis=0)
    assign_mats = [(assign_index, S.reshape(-1))]

    return out_x, sup1, out_y, sup2, assign_mats, recon_y


# ----------------------------------- main ------------------------------------

if __name__ == "__main__":
    in_channels, nhid, out_channels = 8, 32, 16
    n1, n2 = 16, 12
    temperature = 1.0

    key = jax.random.PRNGKey(0)
    kp, kx, ky, ka1, km1, ka2, km2 = jax.random.split(key, 7)

    params = init_params(kp, in_channels, nhid, out_channels)

    # node features
    x = jax.random.normal(kx, (n1, in_channels), jnp.float32)
    y = jax.random.normal(ky, (n2, in_channels), jnp.float32)

    # random symmetric weighted adjacencies (dense stand-in for edge_index /
    # edge_weight), zero diagonal
    def rand_adj(kw, kmask, n, p=0.4):
        w = jax.random.uniform(kw, (n, n), jnp.float32)
        m = (jax.random.uniform(kmask, (n, n)) < p).astype(jnp.float32)
        a = w * m
        a = 0.5 * (a + a.T)
        return a * (1.0 - jnp.eye(n, dtype=jnp.float32))

    A1 = rand_adj(ka1, km1, n1)
    A2 = rand_adj(ka2, km2, n2)

    # anchor links: node i of graph 1 aligned with node i of graph 2 (first 4)
    anchor_links = jnp.array([[0, 1, 2, 3], [0, 1, 2, 3]], dtype=jnp.int32)
    L = jnp.zeros((n1, n2), jnp.float32).at[anchor_links[0],
                                            anchor_links[1]].set(1.0)

    outs = nettrans_forward(params, x, A1, y, A2, L, temperature,
                            pool_ratio=0.5, k_hops=10)
    out_x, sup1, out_y, sup2, assign_mats, recon_y = outs

    jax.block_until_ready((out_x, sup1, out_y, sup2,
                           assign_mats[0][0], assign_mats[0][1], recon_y))

    k_sup = math.ceil(0.5 * n1)
    assert out_x.shape == (n1, nhid)
    assert sup1.shape == (k_sup, nhid)
    assert out_y.shape == (n2, nhid)
    assert sup2.shape == (k_sup, nhid)
    assert recon_y.shape == (n2, out_channels)
    assert assign_mats[0][0].shape == (2, k_sup * n1)
    assert assign_mats[0][1].shape == (k_sup * n1,)

    print("KERNEL_OK")
</pallas_src>

<mosaic_0001>
module attributes {stable_mosaic.version = 11 : i64} {
  func.func @_gcn_pool_score_kernel(%arg0: memref<16x16xf32, #tpu.memory_space<vmem>>, %arg1: memref<16x8xf32, #tpu.memory_space<vmem>>, %arg2: memref<8x32xf32, #tpu.memory_space<vmem>>, %arg3: memref<1x32xf32, #tpu.memory_space<vmem>>, %arg4: memref<1x32xf32, #tpu.memory_space<vmem>>, %arg5: memref<16x32xf32, #tpu.memory_space<vmem>>, %arg6: memref<16x32xf32, #tpu.memory_space<vmem>>, %arg7: memref<16x1xf32, #tpu.memory_space<vmem>>) attributes {dimension_semantics = [], scalar_prefetch = 0 : i64, scratch_operands = 0 : i64, tpu.core_type = #tpu.core_type<tc>} {
    %c0 = arith.constant 0 : index
    %c0_0 = arith.constant 0 : index
    %0 = vector.load %arg0[%c0, %c0_0] : memref<16x16xf32, #tpu.memory_space<vmem>>, vector<16x16xf32>
    %1 = tpu.iota {dimensions = array<i32: 0>} : vector<16x16xi32>
    %2 = tpu.iota {dimensions = array<i32: 1>} : vector<16x16xi32>
    %3 = arith.cmpi eq, %1, %2 : vector<16x16xi32>
    %4 = arith.extui %3 : vector<16x16xi1> to vector<16x16xi32>
    %5 = arith.sitofp %4 : vector<16x16xi32> to vector<16x16xf32>
    %6 = arith.addf %0, %5 : vector<16x16xf32>
    %cst = arith.constant dense<0.000000e+00> : vector<16xf32>
    %7 = vector.multi_reduction <add>, %6, %cst [1] : vector<16x16xf32> to vector<16xf32>
    %8 = vector.shape_cast %7 : vector<16xf32> to vector<16x1xf32>
    %cst_1 = arith.constant dense<0.000000e+00> : vector<16xf32>
    %9 = vector.multi_reduction <add>, %6, %cst_1 [0] : vector<16x16xf32> to vector<16xf32>
    %10 = vector.shape_cast %9 : vector<16xf32> to vector<1x16xf32>
    %cst_2 = arith.constant 0.000000e+00 : f32
    %11 = vector.broadcast %cst_2 : f32 to vector<16x1xf32>
    %12 = arith.cmpf ogt, %8, %11 : vector<16x1xf32>
    %13 = math.rsqrt %8 : vector<16x1xf32>
    %cst_3 = arith.constant 0.000000e+00 : f32
    %14 = vector.broadcast %cst_3 : f32 to vector<16x1xf32>
    %15 = arith.select %12, %13, %14 : vector<16x1xi1>, vector<16x1xf32>
    %cst_4 = arith.constant 0.000000e+00 : f32
    %16 = vector.broadcast %cst_4 : f32 to vector<1x16xf32>
    %17 = arith.cmpf ogt, %10, %16 : vector<1x16xf32>
    %18 = math.rsqrt %10 : vector<1x16xf32>
    %cst_5 = arith.constant 0.000000e+00 : f32
    %19 = vector.broadcast %cst_5 : f32 to vector<1x16xf32>
    %20 = arith.select %17, %18, %19 : vector<1x16xi1>, vector<1x16xf32>
    %21 = vector.broadcast %15 : vector<16x1xf32> to vector<16x16xf32>
    %22 = arith.mulf %21, %6 : vector<16x16xf32>
    %23 = vector.broadcast %20 : vector<1x16xf32> to vector<16x16xf32>
    %24 = arith.mulf %22, %23 : vector<16x16xf32>
    %c0_6 = arith.constant 0 : index
    %c0_7 = arith.constant 0 : index
    %25 = vector.load %arg1[%c0_6, %c0_7] : memref<16x8xf32, #tpu.memory_space<vmem>>, vector<16x8xf32>
    %cst_8 = arith.constant dense<0.000000e+00> : vector<16x8xf32>
    %26 = tpu.matmul %24, %25, %cst_8 {dimension_numbers = #tpu.dot_dimension_numbers<[1], [0], [0], [1], [0, 0, 1, 1], [], []>} : vector<16x16xf32>, vector<16x8xf32>, vector<16x8xf32> -> vector<16x8xf32>
    %cst_9 = arith.constant dense<0.000000e+00> : vector<16x8xf32>
    %27 = tpu.matmul %24, %26, %cst_9 {dimension_numbers = #tpu.dot_dimension_numbers<[1], [0], [0], [1], [0, 0, 1, 1], [], []>} : vector<16x16xf32>, vector<16x8xf32>, vector<16x8xf32> -> vector<16x8xf32>
    %cst_10 = arith.constant dense<0.000000e+00> : vector<16x8xf32>
    %28 = tpu.matmul %24, %27, %cst_10 {dimension_numbers = #tpu.dot_dimension_numbers<[1], [0], [0], [1], [0, 0, 1, 1], [], []>} : vector<16x16xf32>, vector<16x8xf32>, vector<16x8xf32> -> vector<16x8xf32>
    %cst_11 = arith.constant dense<0.000000e+00> : vector<16x8xf32>
    %29 = tpu.matmul %24, %28, %cst_11 {dimension_numbers = #tpu.dot_dimension_numbers<[1], [0], [0], [1], [0, 0, 1, 1], [], []>} : vector<16x16xf32>, vector<16x8xf32>, vector<16x8xf32> -> vector<16x8xf32>
    %cst_12 = arith.constant dense<0.000000e+00> : vector<16x8xf32>
    %30 = tpu.matmul %24, %29, %cst_12 {dimension_numbers = #tpu.dot_dimension_numbers<[1], [0], [0], [1], [0, 0, 1, 1], [], []>} : vector<16x16xf32>, vector<16x8xf32>, vector<16x8xf32> -> vector<16x8xf32>
    %cst_13 = arith.constant dense<0.000000e+00> : vector<16x8xf32>
    %31 = tpu.matmul %24, %30, %cst_13 {dimension_numbers = #tpu.dot_dimension_numbers<[1], [0], [0], [1], [0, 0, 1, 1], [], []>} : vector<16x16xf32>, vector<16x8xf32>, vector<16x8xf32> -> vector<16x8xf32>
    %cst_14 = arith.constant dense<0.000000e+00> : vector<16x8xf32>
    %32 = tpu.matmul %24, %31, %cst_14 {dimension_numbers = #tpu.dot_dimension_numbers<[1], [0], [0], [1], [0, 0, 1, 1], [], []>} : vector<16x16xf32>, vector<16x8xf32>, vector<16x8xf32> -> vector<16x8xf32>
    %cst_15 = arith.constant dense<0.000000e+00> : vector<16x8xf32>
    %33 = tpu.matmul %24, %32, %cst_15 {dimension_numbers = #tpu.dot_dimension_numbers<[1], [0], [0], [1], [0, 0, 1, 1], [], []>} : vector<16x16xf32>, vector<16x8xf32>, vector<16x8xf32> -> vector<16x8xf32>
    %cst_16 = arith.constant dense<0.000000e+00> : vector<16x8xf32>
    %34 = tpu.matmul %24, %33, %cst_16 {dimension_numbers = #tpu.dot_dimension_numbers<[1], [0], [0], [1], [0, 0, 1, 1], [], []>} : vector<16x16xf32>, vector<16x8xf32>, vector<16x8xf32> -> vector<16x8xf32>
    %cst_17 = arith.constant dense<0.000000e+00> : vector<16x8xf32>
    %35 = tpu.matmul %24, %34, %cst_17 {dimension_numbers = #tpu.dot_dimension_numbers<[1], [0], [0], [1], [0, 0, 1, 1], [], []>} : vector<16x16xf32>, vector<16x8xf32>, vector<16x8xf32> -> vector<16x8xf32>
    %c0_18 = arith.constant 0 : index
    %c0_19 = arith.constant 0 : index
    %36 = vector.load %arg2[%c0_18, %c0_19] : memref<8x32xf32, #tpu.memory_space<vmem>>, vector<8x32xf32>
    %cst_20 = arith.constant dense<0.000000e+00> : vector<16x32xf32>
    %37 = tpu.matmul %35, %36, %cst_20 {dimension_numbers = #tpu.dot_dimension_numbers<[1], [0], [0], [1], [0, 0, 1, 1], [], []>} : vector<16x8xf32>, vector<8x32xf32>, vector<16x32xf32> -> vector<16x32xf32>
    %c0_21 = arith.constant 0 : index
    %c0_22 = arith.constant 0 : index
    %38 = vector.load %arg3[%c0_21, %c0_22] : memref<1x32xf32, #tpu.memory_space<vmem>>, vector<1x32xf32>
    %39 = vector.broadcast %38 : vector<1x32xf32> to vector<16x32xf32>
    %40 = arith.addf %37, %39 : vector<16x32xf32>
    %c0_23 = arith.constant 0 : index
    %c0_24 = arith.constant 0 : index
    %41 = vector.load %arg5[%c0_23, %c0_24] : memref<16x32xf32, #tpu.memory_space<vmem>>, vector<16x32xf32>
    tpu.vector_store %arg5[%c0_23, %c0_24], %40 {strides = array<i32>} : memref<16x32xf32, #tpu.memory_space<vmem>>, vector<16x32xf32>,
    %cst_25 = arith.constant 0.000000e+00 : f32
    %42 = vector.broadcast %cst_25 : f32 to vector<16x32xf32>
    %43 = arith.maximumf %40, %42 : vector<16x32xf32>
    %c0_26 = arith.constant 0 : index
    %c0_27 = arith.constant 0 : index
    %44 = vector.load %arg6[%c0_26, %c0_27] : memref<16x32xf32, #tpu.memory_space<vmem>>, vector<16x32xf32>
    tpu.vector_store %arg6[%c0_26, %c0_27], %43 {strides = array<i32>} : memref<16x32xf32, #tpu.memory_space<vmem>>, vector<16x32xf32>,
    %c0_28 = arith.constant 0 : index
    %c0_29 = arith.constant 0 : index
    %45 = vector.load %arg4[%c0_28, %c0_29] : memref<1x32xf32, #tpu.memory_space<vmem>>, vector<1x32xf32>
    %46 = vector.broadcast %45 : vector<1x32xf32> to vector<16x32xf32>
    %47 = arith.mulf %43, %46 : vector<16x32xf32>
    %cst_30 = arith.constant dense<0.000000e+00> : vector<16xf32>
    %48 = vector.multi_reduction <add>, %47, %cst_30 [1] : vector<16x32xf32> to vector<16xf32>
    %49 = vector.shape_cast %48 : vector<16xf32> to vector<16x1xf32>
    %c0_31 = arith.constant 0 : index
    %c0_32 = arith.constant 0 : index
    %50 = vector.load %arg7[%c0_31, %c0_32] : memref<16x1xf32, #tpu.memory_space<vmem>>, vector<16x1xf32>
    tpu.vector_store %arg7[%c0_31, %c0_32], %49 {strides = array<i32>} : memref<16x1xf32, #tpu.memory_space<vmem>>, vector<16x1xf32>,
    return
  }
}

</mosaic_0001>

<bundles_post_ra>
// kernel: tpu_custom_call.1
= control target key start
LH: loop header
LB: loop body
LE: loop exit
PB: predicated region body
PF: predicated region fallthrough
CT: control target
= control target key end

     0   :  { %13 = vsyncpa [#allocation3], 0  ;;  %v27_v0 = vlaneseq  ;;  %s1299_s0 = inlined_call_operand.vmem [shape: f32[16,16], index: 0, kind: input, shape index: {}]   ;;  %s1300_s1 = inlined_call_operand.vmem [shape: f32[16,8], index: 1, kind: input, shape index: {}]   ;;  %s1301_s2 = inlined_call_operand.vmem [shape: f32[8,32], index: 2, kind: input, shape index: {}]   ;;  %s1302_s3 = inlined_call_operand.vmem [shape: f32[1,32], index: 3, kind: input, shape index: {}]   ;;  %s1303_s4 = inlined_call_operand.vmem [shape: f32[1,32], index: 4, kind: input, shape index: {}]   ;;  %s1304_s5 = inlined_call_operand.hbm [shape: f32[16,32], index: 5, kind: output, shape index: {0}]   ;;  %s1305_s6 = inlined_call_operand.hbm [shape: f32[16,32], index: 6, kind: output, shape index: {1}]   ;;  %s1306_s7 = inlined_call_operand.vmem [shape: f32[16,1], index: 7, kind: output, shape index: {2}]  }
   0x1   :  { %14 = vsyncpa [#allocation5], 0  ;;  %v25_v3 = vld [vmem:[%s1299_s0] sm:$0xff]  ;;  %v1175_v5 = vmov 0.0   ;;  %vm40_vm1 = vcmask 130048   ;;  %v26_v7 = vld [vmem:[%s1299_s0 + $0x8] sm:$0xff] }
   0x2   :  { %v28_v1 = vshrl.u32 %v27_v0, 7  ;;  %v31_v2 = vand.u32 127, %v27_v0  ;;  %v68_v14 = vld [vmem:[%s1300_s1 + $0x8] sm:$0xff]  ;;  %v67_v15 = vld [vmem:[%s1300_s1] sm:$0xff]  ;;  %vm833_vm6 = vcmask 64512   ;;  %vm915_vm7 = vcmask 261120  }
   0x3   :  { %1045 = vmatprep.subr.mxu0 %v68_v14  ;;  %v825_v52 = vld [vmem:[%s1301_s2] sm:$0xff]  ;;  %s1177_s13 = smov [#allocation4]  }
   0x4   :  { %vm32_vm0 = vcmp.eq.s32.totalorder %v28_v1, %v31_v2  ;;  %v29_v4 = vadd.s32 8, %v28_v1  ;;  %1046 = vmatpush3.msra.mxu0 %v68_v14  ;;  %v998_v55 = vld [vmem:[%s1302_s3] ss:$0 sm:$0xff]  ;;  %s1176_s3 = smov [#allocation2]   ;;  %s957_s14 = sshll.u32 %s1177_s13, 4  ;;  %s958_s14 = int_to_ptr.vmem [resolvable:$true] %s957_s14 }
   0x5   :  { %v976_v6 = vsel %vm32_vm0, 1.0, %v1175_v5  ;;  %1047 = vmatprep.subr.mxu0 %v67_v15  ;;  %v1001_v62 = vld [vmem:[%s1303_s4] ss:$0 sm:$0xff]  ;;  %s945_s12 = sshll.u32 %s1176_s3, 4  ;;  %s946_s12 = int_to_ptr.vmem [resolvable:$true] %s945_s12 }
   0x6   :  { %v38_v8 = vadd.f32 %v976_v6, %v25_v3  ;;  %vm33_vm2 = vcmp.eq.s32.totalorder %v29_v4, %v31_v2  ;;  %1048 = vmatpush3.msra.mxu0 %v67_v15  ;;  %s1131_s15 = scalar_lea.vmem %s946_s12, 256  ;;  %p1136_p1 = scmp.lt.s32.totalorder %s946_s12, %s946_s12 }
   0x7   :  { %v977_v9 = vsel %vm33_vm2, 1.0, %v1175_v5  ;;  %p1132_p0 = scmp.ne.s32.totalorder %s946_s12, %s1131_s15  ;;  %p1137_p2 = scmp.lt.s32.totalorder %s1131_s15, %s1131_s15 }
   0x8   :  { %v41_v10 = vsel %vm40_vm1, %v38_v8, 0.0  ;;  %v39_v11 = vadd.f32 %v977_v9, %v26_v7 }
   0x9   :  { %42 = vadd.xlane.f32.xlu0 %v41_v10  ;;  %p1138_p3 = por %p1137_p2, %p1136_p1 }
   0xa   :  { %v44_v12 = vsel %vm40_vm1, %v39_v11, 0.0 }
   0xb   :  { %v47_v13 = vadd.f32 %v44_v12, %v41_v10  ;;  %p1139_p4 = pnand %p1138_p3, %p1132_p0 }
   0xd   :  { %45 = vadd.xlane.f32.xlu0 %v44_v12  ;;  %v48_v16 = vrot.slane %v47_v13, 4 }
   0xf   :  { %v49_v17 = vadd.f32 %v48_v16, %v47_v13 }
  0x11   :  { %v50_v18 = vrot.slane %v49_v17, 2 }
  0x13   :  { %v51_v19 = vadd.f32 %v50_v18, %v49_v17 }
  0x15   :  { %v52_v20 = vrot.slane %v51_v19, 1 }
  0x17   :  { %v53_v21 = vadd.f32 %v52_v20, %v51_v19 }
  0x19   :  { %1125 = vrsqrt.f32 %v53_v21  ;;  %vm60_vm3 = vcmp.gt.f32.partialorder %v53_v21, 0.0 }
  0x26   :  { %v1126_v24 = vpop.eup %1125 }
  0x27   :  { %v62_v27 = vsel %vm60_vm3, %v1126_v24, 0.0 }
  0x92   :  { %v43_v22 = vpop.xlane.xlu0 %42 }
  0x93   :  { %1127 = vrsqrt.f32 %v43_v22  ;;  %vm54_vm4 = vcmp.gt.f32.partialorder %v43_v22, 0.0 }
  0x96   :  { %v46_v23 = vpop.xlane.xlu0 %45 }
  0x97   :  { %1129 = vrsqrt.f32 %v46_v23  ;;  %vm55_vm5 = vcmp.gt.f32.partialorder %v46_v23, 0.0 }
  0xa0   :  { %v1128_v25 = vpop.eup %1127 }
  0xa1   :  { %v58_v26 = vsel %vm54_vm4, %v1128_v25, 0.0 }
  0xa2   :  { %v63_v28 = vmul.f32 %v58_v26, %v38_v8 }
  0xa4   :  { %v1130_v29 = vpop.eup %1129  ;;  %v1234_v30 = vmul.f32 %v63_v28, %v62_v27 }
  0xa5   :  { %v59_v31 = vsel %vm55_vm5, %v1130_v29, 0.0 }
  0xa6   :  { %v64_v32 = vmul.f32 %v59_v31, %v39_v11  ;;  %1049 = vmatprep.mubr.msk.f32.mxu0 %vm40_vm1, %v1234_v30  ;;  %1056 = vmatprep.mubr.msk.f32.mxu1 %vm40_vm1, %v1234_v30 }
  0xa8   :  { %v1240_v33 = vmul.f32 %v64_v32, %v62_v27 }
  0xaa   :  { %1050 = vmatmul.mubr.msk.f32.vlgmr.msra.gmra.mxu0 %vm40_vm1, %v1240_v33 }
  0xab   :  { %1063 = vmatprep.mubr.msk.f32.mxu0 %vm40_vm1, %v1234_v30 }
 0x16a   :  { %v1051_v34 = vpop.f32.mrf.mxu0 }
 0x16b   :  { %1052 = vmatprep.subr.mxu1 %v1051_v34 }
 0x16c   :  { %v141_v35 = vpop.f32.mrf.mxu0  ;;  %1053 = vmatpush3.msra.mxu1 %v1051_v34 }
 0x16d   :  { %1054 = vmatprep.subr.mxu1 %v141_v35 }
 0x16e   :  { %1055 = vmatpush3.msra.mxu1 %v141_v35 }
 0x16f   :  { %1057 = vmatmul.mubr.msk.f32.vlgmr.msra.gmra.mxu1 %vm40_vm1, %v1240_v33 }
 0x170   :  { %1070 = vmatprep.mubr.msk.f32.mxu1 %vm40_vm1, %v1234_v30 }
 0x22f   :  { %v1058_v36 = vpop.f32.mrf.mxu1 }
 0x230   :  { %1059 = vmatprep.subr.mxu0 %v1058_v36 }
 0x231   :  { %v216_v37 = vpop.f32.mrf.mxu1  ;;  %1060 = vmatpush3.msra.mxu0 %v1058_v36 }
 0x232   :  { %1061 = vmatprep.subr.mxu0 %v216_v37 }
 0x233   :  { %1062 = vmatpush3.msra.mxu0 %v216_v37 }
 0x234   :  { %1064 = vmatmul.mubr.msk.f32.vlgmr.msra.gmra.mxu0 %vm40_vm1, %v1240_v33 }
 0x235   :  { %1077 = vmatprep.mubr.msk.f32.mxu0 %vm40_vm1, %v1234_v30 }
 0x2f4   :  { %v1065_v38 = vpop.f32.mrf.mxu0 }
 0x2f5   :  { %1066 = vmatprep.subr.mxu1 %v1065_v38 }
 0x2f6   :  { %v291_v39 = vpop.f32.mrf.mxu0  ;;  %1067 = vmatpush3.msra.mxu1 %v1065_v38 }
 0x2f7   :  { %1068 = vmatprep.subr.mxu1 %v291_v39 }
 0x2f8   :  { %1069 = vmatpush3.msra.mxu1 %v291_v39 }
 0x2f9   :  { %1071 = vmatmul.mubr.msk.f32.vlgmr.msra.gmra.mxu1 %vm40_vm1, %v1240_v33 }
 0x2fa   :  { %1084 = vmatprep.mubr.msk.f32.mxu1 %vm40_vm1, %v1234_v30 }
 0x3b9   :  { %v1072_v40 = vpop.f32.mrf.mxu1 }
 0x3ba   :  { %1073 = vmatprep.subr.mxu0 %v1072_v40 }
 0x3bb   :  { %v366_v41 = vpop.f32.mrf.mxu1  ;;  %1074 = vmatpush3.msra.mxu0 %v1072_v40 }
 0x3bc   :  { %1075 = vmatprep.subr.mxu0 %v366_v41 }
 0x3bd   :  { %1076 = vmatpush3.msra.mxu0 %v366_v41 }
 0x3be   :  { %1078 = vmatmul.mubr.msk.f32.vlgmr.msra.gmra.mxu0 %vm40_vm1, %v1240_v33 }
 0x3bf   :  { %1091 = vmatprep.mubr.msk.f32.mxu0 %vm40_vm1, %v1234_v30 }
 0x47e   :  { %v1079_v42 = vpop.f32.mrf.mxu0 }
 0x47f   :  { %1080 = vmatprep.subr.mxu1 %v1079_v42 }
 0x480   :  { %v441_v43 = vpop.f32.mrf.mxu0  ;;  %1081 = vmatpush3.msra.mxu1 %v1079_v42 }
 0x481   :  { %1082 = vmatprep.subr.mxu1 %v441_v43 }
 0x482   :  { %1083 = vmatpush3.msra.mxu1 %v441_v43 }
 0x483   :  { %1085 = vmatmul.mubr.msk.f32.vlgmr.msra.gmra.mxu1 %vm40_vm1, %v1240_v33 }
 0x484   :  { %1098 = vmatprep.mubr.msk.f32.mxu1 %vm40_vm1, %v1234_v30 }
 0x543   :  { %v1086_v44 = vpop.f32.mrf.mxu1 }
 0x544   :  { %1087 = vmatprep.subr.mxu0 %v1086_v44 }
 0x545   :  { %v516_v45 = vpop.f32.mrf.mxu1  ;;  %1088 = vmatpush3.msra.mxu0 %v1086_v44 }
 0x546   :  { %1089 = vmatprep.subr.mxu0 %v516_v45 }
 0x547   :  { %1090 = vmatpush3.msra.mxu0 %v516_v45 }
 0x548   :  { %1092 = vmatmul.mubr.msk.f32.vlgmr.msra.gmra.mxu0 %vm40_vm1, %v1240_v33 }
 0x549   :  { %1105 = vmatprep.mubr.msk.f32.mxu0 %vm40_vm1, %v1234_v30 }
 0x608   :  { %v1093_v46 = vpop.f32.mrf.mxu0 }
 0x609   :  { %1094 = vmatprep.subr.mxu1 %v1093_v46 }
 0x60a   :  { %v591_v47 = vpop.f32.mrf.mxu0  ;;  %1095 = vmatpush3.msra.mxu1 %v1093_v46 }
 0x60b   :  { %1096 = vmatprep.subr.mxu1 %v591_v47 }
 0x60c   :  { %1097 = vmatpush3.msra.mxu1 %v591_v47 }
 0x60d   :  { %1099 = vmatmul.mubr.msk.f32.vlgmr.msra.gmra.mxu1 %vm40_vm1, %v1240_v33 }
 0x60e   :  { %1112 = vmatprep.mubr.msk.f32.mxu1 %vm40_vm1, %v1234_v30 }
 0x6cd   :  { %v1100_v48 = vpop.f32.mrf.mxu1 }
 0x6ce   :  { %1101 = vmatprep.subr.mxu0 %v1100_v48 }
 0x6cf   :  { %v666_v49 = vpop.f32.mrf.mxu1  ;;  %1102 = vmatpush3.msra.mxu0 %v1100_v48 }
 0x6d0   :  { %1103 = vmatprep.subr.mxu0 %v666_v49 }
 0x6d1   :  { %1104 = vmatpush3.msra.mxu0 %v666_v49 }
 0x6d2   :  { %1106 = vmatmul.mubr.msk.f32.vlgmr.msra.gmra.mxu0 %vm40_vm1, %v1240_v33  ;;  %1115 = vmatprep.subr.mxu0 %v825_v52 }
 0x6d3   :  { %1116 = vmatpush3.msra.mxu0 %v825_v52 }
 0x792   :  { %v1107_v50 = vpop.f32.mrf.mxu0 }
 0x793   :  { %1108 = vmatprep.subr.mxu1 %v1107_v50 }
 0x794   :  { %v741_v51 = vpop.f32.mrf.mxu0  ;;  %1109 = vmatpush3.msra.mxu1 %v1107_v50 }
 0x795   :  { %1110 = vmatprep.subr.mxu1 %v741_v51 }
 0x796   :  { %1111 = vmatpush3.msra.mxu1 %v741_v51 }
 0x797   :  { %1113 = vmatmul.mubr.msk.f32.vlgmr.msra.gmra.mxu1 %vm40_vm1, %v1240_v33 }
 0x857   :  { %v1114_v53 = vpop.f32.mrf.mxu1 }
 0x859   :  { %v816_v54 = vpop.f32.mrf.mxu1 }
 0x85a   :  { %1117 = vmatprep.mubr.msk.f32.mxu0 %vm833_vm6, %v816_v54 }
 0x85b   :  { %1118 = vmatmul.mubr.msk.f32.vlgmr.msra.gmra.mxu0 %vm833_vm6, %v1114_v53 }
 0x91b   :  { %v1119_v56 = vpop.f32.mrf.mxu0 }
 0x91c   :  { %v912_v57 = vadd.f32 %v1119_v56, %v998_v55 }
 0x91d   :  { %v906_v58 = vpop.f32.mrf.mxu0 }
 0x91e   :  { %917 = vst.msk [vmem:[#allocation2 + $0x8] sm:$0xff] %vm915_vm7, %v912_v57  ;;  %v919_v59 = vmax.f32 %v912_v57, 0.0  ;;  %v907_v60 = vadd.f32 %v998_v55, %v906_v58 }
 0x920   :  { %921 = vst.msk [vmem:[#allocation4 + $0x8] sm:$0xff] %vm915_vm7, %v919_v59  ;;  %916 = vst.msk [vmem:[#allocation2] sm:$0xff] %vm915_vm7, %v907_v60  ;;  %v918_v61 = vmax.f32 %v907_v60, 0.0  ;;  %v930_v1 = vmul.f32 %v1001_v62, %v919_v59 }
 0x922   :  { %920 = vst.msk [vmem:[#allocation4] sm:$0xff] %vm915_vm7, %v918_v61  ;;  %v929_v63 = vmul.f32 %v1001_v62, %v918_v61  ;;  %v934_v2 = vsel %vm915_vm7, %v930_v1, 0.0 }
 0x924   :  { %v931_v0 = vsel %vm915_vm7, %v929_v63, 0.0 }
 0x925   :  { %932 = vadd.xlane.f32.xlu1 %v931_v0 }
 0x929   :  { %935 = vadd.xlane.f32.xlu1 %v934_v2 }
 0x92a   :  { %1142 = shalt.err (!%p1139_p4)
}
 0x92b   :  { %s1178_s4 = smov 128   ;;  %s1179_s16 = smov 8  }
 0x92c   :  { %951 = dma.vmem_to_hbm [thread:$0]  %s946_s12, 256, %s1304_s5, [#allocation3], %s1178_s4, %s1178_s4, %s1179_s16  }
 0x92d   :  { %s1151_s19 = scalar_lea.vmem %s958_s14, 256  ;;  %p1156_p6 = scmp.lt.s32.totalorder %s958_s14, %s958_s14 }
 0x92e   :  { %p1152_p5 = scmp.ne.s32.totalorder %s958_s14, %s1151_s19  ;;  %p1157_p7 = scmp.lt.s32.totalorder %s1151_s19, %s1151_s19 }
 0x930   :  { %p1158_p8 = por %p1157_p7, %p1156_p6 }
 0x932   :  { %p1159_p9 = pnand %p1158_p8, %p1152_p5 }
 0x934   :  { %1162 = shalt.err (!%p1159_p9)
}
 0x935   :  { %963 = dma.vmem_to_hbm [thread:$0]  %s958_s14, 256, %s1305_s6, [#allocation5], %s1178_s4, %s1178_s4, %s1179_s16   ;;  %vm937_vm8 = vcmask 7168  }
 0x9ae   :  { %v933_v3 = vpop.xlane.xlu1 %932 }
 0x9af   :  { %938 = vst.msk [vmem:[%s1306_s7] sm:$0xff] %vm937_vm8, %v933_v3 }
 0x9b2   :  { %v936_v4 = vpop.xlane.xlu1 %935 }
 0x9b3   :  { %939 = vst.msk [vmem:[%s1306_s7 + $0x8] sm:$0xff] %vm937_vm8, %v936_v4 }
 0x9b4   :  { %1171 = dma.done.wait [#allocation3], 256  }
 0x9b5   :  { %1172 = vsyncadd [#allocation3], 4294967040 }
 0x9b6   :  { %1173 = dma.done.wait [#allocation5], 256  }
 0x9b7   :  { %1174 = vsyncadd [#allocation5], 4294967040 }
 0x9b8   :  { %974 = vsyncpa [#allocation3], 1 }
 0x9b9   :  { %975 = vsyncpa [#allocation5], 1 }

</bundles_post_ra>
